<compile_context>
chip_gen: v7x
topology: tpu7x:2x2x1
jax: 0.10.0
libtpu: 0.0.40
codegen_flags: <defaults>
</compile_context>

<pallas_src>
import math

import jax
import jax.numpy as jnp
from jax import lax
from jax.experimental import pallas as pl
from jax.experimental.pallas import tpu as pltpu

EPS = 1e-5


def _sinusoidal_pos_emb(timestep, num_steps, dim, rescale_steps=4000.0):
    """SinusoidalPosEmb.forward (plain JAX glue; tiny, not worth a kernel)."""
    t = timestep.astype(jnp.float32) / float(num_steps) * float(rescale_steps)
    half_dim = dim // 2
    freq = jnp.exp(
        jnp.arange(half_dim, dtype=jnp.float32) * -(math.log(10000.0) / (half_dim - 1))
    )
    e = t[:, None] * freq[None, :]
    return jnp.concatenate([jnp.sin(e), jnp.cos(e)], axis=-1)  # (B, dim)


def _ada_ins_norm_kernel(scale_ref, shift_ref, x_ref, o_ref):
    # scale_ref, shift_ref: (1, 1, C_TILE)
    # x_ref, o_ref:         (1, T, C_TILE)
    x = x_ref[0].astype(jnp.float32)                       # (T, C_TILE)
    mean = jnp.mean(x, axis=0, keepdims=True)              # (1, C_TILE), reduce over T
    xc = x - mean                                          # reused for var + norm
    var = jnp.mean(xc * xc, axis=0, keepdims=True)         # biased variance (InstanceNorm1d)
    x_norm = xc * lax.rsqrt(var + EPS)
    out = x_norm * (1.0 + scale_ref[0]) + shift_ref[0]     # broadcast (1,C_TILE) over T
    o_ref[0] = out.astype(o_ref.dtype)


def _pick_c_tile(C, T, itemsize, vmem_budget_bytes=40 * 1024 * 1024):
    """Largest lane-dense (multiple-of-128) channel tile that divides C and fits VMEM."""
    if C % 128 != 0:
        # Full lane extent (the 'equal to full dim' exception of the (8,128) rule).
        return C
    for k in range(C // 128, 0, -1):
        cand = 128 * k
        # 2x double-buffered input + 2x double-buffered output blocks.
        if C % cand == 0 and 4 * T * cand * itemsize <= vmem_budget_bytes:
            return cand
    return 128


def ada_ins_norm(x, timestep, w, b, *, max_timestep):
    """x: (B, T, C); timestep: (B,); w: (C, 2C) [transposed vs torch]; b: (2C,)."""
    B, T, C = x.shape

    # --- tiny projection done once in plain JAX (one batched (B,C)@(C,2C)) ---
    emb = _sinusoidal_pos_emb(timestep, max_timestep, C)            # (B, C) f32
    h = emb * jax.nn.sigmoid(emb)                                   # SiLU
    proj = h @ w.astype(jnp.float32) + b.astype(jnp.float32)[None, :]   # (B, 2C)
    scale = proj[:, :C].reshape(B, 1, C)                            # (B, 1, C)
    shift = proj[:, C:].reshape(B, 1, C)                            # (B, 1, C)

    itemsize = jnp.dtype(x.dtype).itemsize
    c_tile = _pick_c_tile(C, T, itemsize)
    n_ctiles = C // c_tile

    # VMEM budget: double-buffered x/out blocks + the tiny scale/shift blocks.
    block_bytes = T * c_tile * itemsize
    needed = 4 * block_bytes + 4 * 2 * c_tile * 4 + (2 << 20)       # + headroom
    vmem_limit = int(min(max(needed, 32 * 1024 * 1024), 48 * 1024 * 1024))

    grid_spec = pltpu.PrefetchScalarGridSpec(
        num_scalar_prefetch=0,
        grid=(B, n_ctiles),
        in_specs=[
            pl.BlockSpec((1, 1, c_tile), lambda bi, ci: (bi, 0, ci)),   # scale
            pl.BlockSpec((1, 1, c_tile), lambda bi, ci: (bi, 0, ci)),   # shift
            pl.BlockSpec((1, T, c_tile), lambda bi, ci: (bi, 0, ci)),   # x
        ],
        out_specs=pl.BlockSpec((1, T, c_tile), lambda bi, ci: (bi, 0, ci)),
    )

    return pl.pallas_call(
        _ada_ins_norm_kernel,
        out_shape=jax.ShapeDtypeStruct((B, T, C), x.dtype),
        grid_spec=grid_spec,
        compiler_params=pltpu.CompilerParams(
            dimension_semantics=("parallel", "parallel"),
            vmem_limit_bytes=vmem_limit,
        ),
    )(scale, shift, x)


def _reference(x, timestep, w, b, *, max_timestep):
    """Pure-JAX reference matching the PyTorch forward."""
    B, T, C = x.shape
    emb = _sinusoidal_pos_emb(timestep, max_timestep, C)
    h = emb * jax.nn.sigmoid(emb)
    proj = h @ w + b[None, :]
    scale, shift = proj[:, :C], proj[:, C:]
    mean = jnp.mean(x, axis=1, keepdims=True)
    var = jnp.mean((x - mean) ** 2, axis=1, keepdims=True)
    x_norm = (x - mean) / jnp.sqrt(var + EPS)
    return x_norm * (1 + scale[:, None, :]) + shift[:, None, :]


def _run_case(key, B, T, C, max_timestep):
    kx, kw, kb, kt = jax.random.split(key, 4)
    x = jax.random.normal(kx, (B, T, C), dtype=jnp.float32)
    # nn.Linear(n_embd, 2*n_embd) weight stored transposed as (C, 2C).
    w = jax.random.normal(kw, (C, 2 * C), dtype=jnp.float32) * (1.0 / math.sqrt(C))
    b = jax.random.normal(kb, (2 * C,), dtype=jnp.float32) * 0.01
    timestep = jax.random.randint(kt, (B,), 0, max_timestep).astype(jnp.float32)

    out = jax.block_until_ready(ada_ins_norm(x, timestep, w, b, max_timestep=max_timestep))
    ref = _reference(x, timestep, w, b, max_timestep=max_timestep)
    assert jnp.allclose(out, ref, atol=1e-4, rtol=1e-4), f"mismatch (B={B},T={T},C={C})"


if __name__ == "__main__":
    key = jax.random.PRNGKey(0)
    k1, k2 = jax.random.split(key, 2)

    # Small shape consistent with the module (batch=2, seq=8, n_embd=32).
    _run_case(k1, B=2, T=8, C=32, max_timestep=100)
    # Slightly larger shape to exercise the lane-dense channel tiling path.
    _run_case(k2, B=2, T=16, C=256, max_timestep=100)

    print("KERNEL_OK")
</pallas_src>

<mosaic_0001>
module attributes {stable_mosaic.version = 11 : i64} {
  func.func @_ada_ins_norm_kernel(%arg0: i32, %arg1: i32, %arg2: memref<1x1x32xf32, #tpu.memory_space<vmem>>, %arg3: memref<1x1x32xf32, #tpu.memory_space<vmem>>, %arg4: memref<1x8x32xf32, #tpu.memory_space<vmem>>, %arg5: memref<1x8x32xf32, #tpu.memory_space<vmem>>) attributes {dimension_semantics = [#tpu.dimension_semantics<parallel>, #tpu.dimension_semantics<parallel>], iteration_bounds = array<i64: 2, 1>, scalar_prefetch = 0 : i64, scratch_operands = 0 : i64, tpu.core_type = #tpu.core_type<tc>, window_params = [{transform_indices = @transform_0, window_bounds = array<i64: 1, 1, 32>}, {transform_indices = @transform_1, window_bounds = array<i64: 1, 1, 32>}, {transform_indices = @transform_2, window_bounds = array<i64: 1, 8, 32>}, {transform_indices = @transform_3, window_bounds = array<i64: 1, 8, 32>}]} {
    %c0 = arith.constant 0 : index
    %c0_0 = arith.constant 0 : index
    %c0_1 = arith.constant 0 : index
    %0 = vector.load %arg4[%c0, %c0_0, %c0_1] : memref<1x8x32xf32, #tpu.memory_space<vmem>>, vector<1x8x32xf32>
    %1 = vector.shape_cast %0 : vector<1x8x32xf32> to vector<8x32xf32>
    %cst = arith.constant dense<0.000000e+00> : vector<32xf32>
    %2 = vector.multi_reduction <add>, %1, %cst [0] : vector<8x32xf32> to vector<32xf32>
    %3 = vector.shape_cast %2 : vector<32xf32> to vector<1x32xf32>
    %cst_2 = arith.constant 8.000000e+00 : f32
    %4 = vector.broadcast %cst_2 : f32 to vector<1x32xf32>
    %5 = arith.divf %3, %4 : vector<1x32xf32>
    %6 = vector.broadcast %5 : vector<1x32xf32> to vector<8x32xf32>
    %7 = arith.subf %1, %6 : vector<8x32xf32>
    %8 = arith.mulf %7, %7 : vector<8x32xf32>
    %cst_3 = arith.constant dense<0.000000e+00> : vector<32xf32>
    %9 = vector.multi_reduction <add>, %8, %cst_3 [0] : vector<8x32xf32> to vector<32xf32>
    %10 = vector.shape_cast %9 : vector<32xf32> to vector<1x32xf32>
    %cst_4 = arith.constant 8.000000e+00 : f32
    %11 = vector.broadcast %cst_4 : f32 to vector<1x32xf32>
    %12 = arith.divf %10, %11 : vector<1x32xf32>
    %cst_5 = arith.constant 9.99999974E-6 : f32
    %13 = vector.broadcast %cst_5 : f32 to vector<1x32xf32>
    %14 = arith.addf %12, %13 : vector<1x32xf32>
    %15 = math.rsqrt %14 : vector<1x32xf32>
    %16 = vector.broadcast %15 : vector<1x32xf32> to vector<8x32xf32>
    %17 = arith.mulf %7, %16 : vector<8x32xf32>
    %c0_6 = arith.constant 0 : index
    %c0_7 = arith.constant 0 : index
    %c0_8 = arith.constant 0 : index
    %18 = vector.load %arg2[%c0_6, %c0_7, %c0_8] : memref<1x1x32xf32, #tpu.memory_space<vmem>>, vector<1x1x32xf32>
    %19 = vector.shape_cast %18 : vector<1x1x32xf32> to vector<1x32xf32>
    %cst_9 = arith.constant 1.000000e+00 : f32
    %20 = vector.broadcast %cst_9 : f32 to vector<1x32xf32>
    %21 = arith.addf %20, %19 : vector<1x32xf32>
    %22 = vector.broadcast %21 : vector<1x32xf32> to vector<8x32xf32>
    %23 = arith.mulf %17, %22 : vector<8x32xf32>
    %c0_10 = arith.constant 0 : index
    %c0_11 = arith.constant 0 : index
    %c0_12 = arith.constant 0 : index
    %24 = vector.load %arg3[%c0_10, %c0_11, %c0_12] : memref<1x1x32xf32, #tpu.memory_space<vmem>>, vector<1x1x32xf32>
    %25 = vector.shape_cast %24 : vector<1x1x32xf32> to vector<1x32xf32>
    %26 = vector.broadcast %25 : vector<1x32xf32> to vector<8x32xf32>
    %27 = arith.addf %23, %26 : vector<8x32xf32>
    %c0_13 = arith.constant 0 : index
    %c0_14 = arith.constant 0 : index
    %c0_15 = arith.constant 0 : index
    %28 = vector.load %arg5[%c0_13, %c0_14, %c0_15] : memref<1x8x32xf32, #tpu.memory_space<vmem>>, vector<1x8x32xf32>
    %29 = vector.shape_cast %28 : vector<1x8x32xf32> to vector<8x32xf32>
    %30 = vector.shape_cast %27 : vector<8x32xf32> to vector<1x8x32xf32>
    tpu.vector_store %arg5[%c0_13, %c0_14, %c0_15], %30 {strides = array<i32>} : memref<1x8x32xf32, #tpu.memory_space<vmem>>, vector<1x8x32xf32>,
    return
  }
  func.func @transform_0(%arg0: i32, %arg1: i32) -> (i32, i32, i32) {
    %c0_i32 = arith.constant 0 : i32
    %c0_i32_0 = arith.constant 0 : i32
    return %arg0, %c0_i32, %arg1 : i32, i32, i32
  }
  func.func @transform_1(%arg0: i32, %arg1: i32) -> (i32, i32, i32) {
    %c0_i32 = arith.constant 0 : i32
    %c0_i32_0 = arith.constant 0 : i32
    return %arg0, %c0_i32, %arg1 : i32, i32, i32
  }
  func.func @transform_2(%arg0: i32, %arg1: i32) -> (i32, i32, i32) {
    %c0_i32 = arith.constant 0 : i32
    %c0_i32_0 = arith.constant 0 : i32
    return %arg0, %c0_i32, %arg1 : i32, i32, i32
  }
  func.func @transform_3(%arg0: i32, %arg1: i32) -> (i32, i32, i32) {
    %c0_i32 = arith.constant 0 : i32
    %c0_i32_0 = arith.constant 0 : i32
    return %arg0, %c0_i32, %arg1 : i32, i32, i32
  }
}

</mosaic_0001>

<bundles_post_ra>
// kernel: tpu_custom_call.1
= control target key start
LH: loop header
LB: loop body
LE: loop exit
PB: predicated region body
PF: predicated region fallthrough
CT: control target
= control target key end

     0   :  { %8 = vsyncpa [#allocation3], 0  ;;  %s921_s0 = inlined_call_operand.hbm [shape: f32[2,1,32], index: 0, kind: input, shape index: {}]   ;;  %s922_s1 = inlined_call_operand.vmem [shape: f32[2,1,32], index: 1, kind: input, shape index: {}]   ;;  %s923_s2 = inlined_call_operand.hbm [shape: f32[2,8,32], index: 2, kind: input, shape index: {}]   ;;  %s924_s3 = inlined_call_operand.hbm [shape: f32[2,8,32], index: 3, kind: output, shape index: {}]  }
   0x1   :  { %10 = vsyncpa [#allocation3 + $0x1], 0 }
   0x2   :  { %11 = vsyncpa [#allocation6], 0 }
   0x3   :  { %13 = vsyncpa [#allocation6 + $0x1], 0 }
   0x4   :  { %14 = vsyncpa [#allocation4], 0 }
   0x5   :  { %16 = vsyncpa [#allocation4 + $0x1], 0  ;;  %s690_s12 = smov 0   ;;  %s692_s13 = smov 0  }
   0x6   :  { %s694_s14 = smov 0   ;;  %s696_s15 = smov 0  }
   0x7   :  { %s698_s16 = smov 0   ;;  %s700_s17 = smov 0  }
   0x8 LB: > { %s435_s18 = sadd.s32 4294967295, %s665_s17   ;;  %s436_s19 = sadd.s32 4294967294, %s665_s17   ;;  %s665_s17 = sphi %s700_s17, %s22_s17   ;;  %s661_s16 = sphi %s698_s16, %s944_s16   ;;  %s657_s15 = sphi %s696_s15, %s943_s15   ;;  %s653_s14 = sphi %s694_s14, %s942_s14   ;;  %s649_s13 = sphi %s692_s13, %s941_s13   ;;  %s645_s12 = sphi %s690_s12, %s940_s12  }
   0x9   : > { %s34_s20 = sadd.s32 1, %s661_s16  ;;  %s43_s21 = sadd.s32 1, %s653_s14 }
   0xa   : > { %p36_p0 = scmp.ge.s32.totalorder %s34_s20, 2  ;;  %p50_p1 = scmp.ne.s32.totalorder %s653_s14, %s649_s13 }
   0xb   : > { %p51_p2 = scmp.eq.s32.totalorder %s665_s17, 0  ;;  %p56_p3 = scmp.ne.s32.totalorder %s649_s13, %s645_s12 }
   0xc   : > { %s946_s20 = smov (%p36_p0, %s34_s20), 0  ;;  %p57_p5 = scmp.eq.s32.totalorder %s435_s18, 0 }
   0xd   : > { %p731_p4 = por %p51_p2, %p50_p1  ;;  %s38_s23 = ssub.s32 %s661_s16, %s946_s20 }
   0xe   : > { %p138_p6 = scmp.eq.s32.totalorder %s435_s18, 1  ;;  %p41_p7 = scmp.eq.s32.totalorder %s38_s23, 0 }
   0xf   : > { %p737_p8 = por %p57_p5, %p56_p3  ;;  %p144_p10 = scmp.eq.s32.totalorder %s436_s19, 1 }
  0x10   : > { %p741_p9 = por %p138_p6, %p50_p1  ;;  %p467_p13 = scmp.lt.s32.totalorder %s665_s17, 2 }
  0x11   : > { %s928_s24 = scalar_select %p737_p8, 1, 0 }
  0x12   : > { %s929_s25 = scalar_select %p741_p9, 1, 0 }
  0x13   : > { %s746_s26 = scalar_select %p41_p7, %s653_s14, %s43_s21  }
  0x14   : > { %p748_p11 = por %p144_p10, %p56_p3  ;;  %s755_s28 = sand.u32 1, %s653_s14  }
  0x15   : > { %s439_s29 = sshll.u32 %s661_s16, 4  ;;  %s167_s30 = scalar_lea.vmem [#allocation2], %s755_s28 }
  0x16   : > { %s930_s27 = scalar_select %p748_p11, 1, 0 }
  0x17   : > { %s175_s4 = sshll.u32 %s167_s30, 4  ;;  %s762_s7 = scalar_lea.hbm %s921_s0, %s439_s29  ;;  %s764_s4 = int_to_ptr.vmem [resolvable:$true] %s175_s4 }
  0x18   : > { %p768_p0 = pnand %p467_p13, %p731_p4  ;;  %s440_s9 = sshll.u32 %s755_s28, 3 }
  0x19   : > { %s165_s10 = scalar_lea.sflag [#allocation3], %s755_s28  ;;  %s519_s11 = scalar_lea.hbm %s762_s7, 16 }
  0x1a   : > { %p520_p3 = scmp.ne.s32.totalorder %s762_s7, %s519_s11  ;;  %p521_p5 = pneg %p768_p0 }
  0x1b   : > { %s524_s21 = scalar_lea.hbm %s921_s0, 32  ;;  %p525_p4 = scmp.lt.u32.totalorder %s762_s7, %s921_s0 }
  0x1c   : > { %p522_p6 = pnand %p521_p5, %p520_p3  ;;  %p526_p10 = scmp.lt.u32.totalorder %s524_s21, %s519_s11 }
  0x1d   : > { %p528_p12 = scmp.lt.u32.totalorder %s519_s11, %s762_s7 }
  0x1e   : > { %p523_p7 = pneg %p522_p6  ;;  %p527_p13 = por %p526_p10, %p525_p4 }
  0x20   : > { %p529_p1 = por %p528_p12, %p527_p13 }
  0x22   : > { %p530_p2 = pnand %p529_p1, %p523_p7 }
  0x24   : > { %533 = shalt.err (!%p530_p2)
}
  0x25   : > { %s534_s29 = scalar_lea.vmem %s764_s4, 16  ;;  %s667_s30 = smov [#allocation2]  }
  0x26   : > { %p535_p3 = scmp.ne.s32.totalorder %s764_s4, %s534_s29  ;;  %s539_s5 = sshll.u32 %s667_s30, 4  ;;  %s540_s5 = int_to_ptr.vmem [resolvable:$false] %s539_s5 }
  0x27   : > { %s541_s6 = scalar_lea.vmem %s540_s5, 32  ;;  %p542_p9 = scmp.lt.s32.totalorder %s764_s4, %s540_s5 }
  0x28   : > { %p537_p6 = pnand %p535_p3, %p521_p5  ;;  %p543_p4 = scmp.lt.s32.totalorder %s541_s6, %s534_s29 }
  0x2a   : > { %p538_p11 = pneg %p537_p6  ;;  %p544_p10 = por %p543_p4, %p542_p9 }
  0x2c   : > { %p545_p12 = pnand %p544_p10, %p538_p11 }
  0x2e   : > { %548 = shalt.err (!%p545_p12)
}
  0x2f   : > { %459 = dma.hbm_to_vmem [thread:$0]  (!%p768_p0), %s762_s7, 16, %s764_s4, %s165_s10  }
  0x30   : > { %p932_p1 = scmp.lt.s32.totalorder %s665_s17, 3  ;;  %p933_p2 = scmp.ge.s32.totalorder %s665_s17, 1 }
  0x31   : > { %s441_s18 = sshll.u32 %s661_s16, 7  ;;  %s195_s19 = scalar_lea.vmem [#allocation5], %s440_s9 }
  0x32   : > { %p805_p7 = pnand %p933_p2, %p932_p1  ;;  %s203_s21 = sshll.u32 %s195_s19, 4  ;;  %s204_s21 = int_to_ptr.vmem [resolvable:$true] %s203_s21 }
  0x33   : > { %s815_s29 = scalar_lea.hbm %s923_s2, %s441_s18  ;;  %s192_s4 = scalar_lea.sflag [#allocation6], %s755_s28 }
  0x34   : > { %s934_s11 = scalar_select %p805_p7, 1, 0 }
  0x35   : > { %s549_s7 = scalar_lea.hbm %s815_s29, 128  ;;  %s554_s30 = scalar_lea.hbm %s923_s2, 256 }
  0x36   : > { %p550_p9 = scmp.ne.s32.totalorder %s815_s29, %s549_s7  ;;  %p555_p3 = scmp.lt.u32.totalorder %s815_s29, %s923_s2 }
  0x37   : > { %p556_p6 = scmp.lt.u32.totalorder %s554_s30, %s549_s7  ;;  %p558_p10 = scmp.lt.u32.totalorder %s549_s7, %s815_s29 }
  0x38   : > { %p552_p11 = pnand %p550_p9, %p521_p5 }
  0x39   : > { %p557_p4 = por %p556_p6, %p555_p3 }
  0x3a   : > { %p553_p13 = pneg %p552_p11 }
  0x3b   : > { %p559_p12 = por %p558_p10, %p557_p4 }
  0x3d   : > { %p560_p1 = pnand %p559_p12, %p553_p13 }
  0x3f   : > { %563 = shalt.err (!%p560_p1)
}
  0x40   : > { %s564_s28 = scalar_lea.vmem %s204_s21, 128  ;;  %s668_s18 = smov [#allocation5]  }
  0x41   : > { %p565_p2 = scmp.ne.s32.totalorder %s204_s21, %s564_s28  ;;  %s569_s19 = sshll.u32 %s668_s18, 4  ;;  %s570_s19 = int_to_ptr.vmem [resolvable:$false] %s569_s19 }
  0x42   : > { %s571_s22 = scalar_lea.vmem %s570_s19, 256  ;;  %p572_p8 = scmp.lt.s32.totalorder %s204_s21, %s570_s19 }
  0x43   : > { %p567_p9 = pnand %p565_p2, %p521_p5  ;;  %p573_p7 = scmp.lt.s32.totalorder %s571_s22, %s564_s28 }
  0x45   : > { %p568_p11 = pneg %p567_p9  ;;  %p574_p3 = por %p573_p7, %p572_p8 }
  0x47   : > { %p575_p6 = pnand %p574_p3, %p568_p11 }
  0x49   : > { %578 = shalt.err (!%p575_p6)
}
  0x4a   : > { %462 = dma.hbm_to_vmem [thread:$0]  (!%p768_p0), %s815_s29, 128, %s204_s21, %s192_s4  }
  0x4b   : > { %p935_p13 = scmp.ne.s32.totalorder %s934_s11, 0 }
  0x4c   : > { %s840_s23 = sand.u32 (!%p935_p13), 1, %s649_s13   ;;  %p936_p5 = scmp.ne.s32.totalorder (!%p935_p13), %s928_s24, 0 }
  0x4d   : > { %212 = sbr.rel (%p935_p13) target bundleno = 156 (0x9c), region = 32  ;;  %s215_s7 = scalar_lea.sflag (!%p935_p13), [#allocation3], %s840_s23 }
  0x4e   : > { %s217_s10 = scalar_lea.vmem (!%p935_p13), [#allocation2], %s840_s23 }
  0x54   : > { %632 = dma.done.wait (%p936_p5), %s215_s7, 16  }
  0x55   : > { %634 = vsyncadd (%p936_p5), %s215_s7, 4294967280  ;;  %s443_s8 = sshll.u32 %s840_s23, 3  ;;  %s223_s11 = scalar_lea.sflag [#allocation6], %s840_s23 }
  0x56   : > { %s226_s21 = scalar_lea.vmem [#allocation5], %s443_s8 }
  0x57   : > { %636 = dma.done.wait (%p936_p5), %s223_s11, 128  }
  0x58   : > { %638 = vsyncadd (%p936_p5), %s223_s11, 4294967168  ;;  %vm266_vm0 = vcmask 261120   ;;  %v265_v0 = vld [vmem:[%s226_s21] sm:$0xff]  ;;  %v292_v19 = vlaneseq  ;;  %p259_p8 = scmp.lt.s32.totalorder %s657_s15, 1  ;;  %v289_v22 = vld [vmem:[%s217_s10] sm:$0x1] }
  0x59   : > { %v267_v1 = vsel %vm266_vm0, %v265_v0, 0.0  ;;  %v290_v23 = vadd.f32 1.0, %v289_v22  ;;  %s258_s30 = scalar_lea.vmem [#allocation7], %s443_s8  ;;  %s447_s6 = sshll.u32 %s657_s15, 7 }
  0x5a   : > { %v268_v2 = vrot.slane %v267_v1, 4  ;;  %v293_v21 = vshrl.u32 %v292_v19, 7  ;;  %s260_s24 = scalar_select %p259_p8, %s657_s15, 1 }
  0x5b   : > { %s322_s5 = sshll.u32 %s258_s30, 4  ;;  %s873_s19 = scalar_lea.hbm %s924_s3, %s447_s6  ;;  %s868_s5 = int_to_ptr.vmem [resolvable:$true] %s322_s5 }
  0x5c   : > { %v269_v3 = vadd.f32 %v268_v2, %v267_v1  ;;  %v294_v24 = vsub.s32 0, %v293_v21  ;;  %s264_s9 = scalar_lea.vmem %s922_s1, %s260_s24  ;;  %s308_s22 = scalar_lea.sflag [#allocation4], %s840_s23 }
  0x5d   : > { %v445_v28 = vld [vmem:[%s264_s9] ss:$0 sm:$0xff]  ;;  %s579_s7 = scalar_lea.vmem %s868_s5, 128  ;;  %p937_p7 = scmp.ne.s32.totalorder %s929_s25, 0 }
  0x5e   : > { %v270_v4 = vrot.slane %v269_v3, 2  ;;  %v295_v25 = vrot.slane %v290_v23, %v294_v24  ;;  %p580_p0 = scmp.ne.s32.totalorder %s868_s5, %s579_s7  ;;  %s669_s15 = smov [#allocation7]  }
  0x5f   : > { %s583_s10 = sshll.u32 %s669_s15, 4  ;;  %s584_s10 = int_to_ptr.vmem [resolvable:$false] %s583_s10 }
  0x60   : > { %v271_v5 = vadd.f32 %v270_v4, %v269_v3  ;;  %p581_p4 = pnand %p580_p0, %p937_p7  ;;  %s585_s8 = scalar_lea.vmem %s584_s10, 256 }
  0x61   : > { %p586_p12 = scmp.lt.s32.totalorder %s868_s5, %s584_s10  ;;  %p587_p1 = scmp.lt.s32.totalorder %s585_s8, %s579_s7 }
  0x62   : > { %v272_v6 = vrot.slane %v271_v5, 1  ;;  %p582_p10 = pneg %p581_p4 }
  0x63   : > { %p588_p2 = por %p587_p1, %p586_p12 }
  0x64   : > { %v273_v7 = vadd.f32 %v272_v6, %v271_v5 }
  0x65   : > { %p589_p9 = pnand %p588_p2, %p582_p10 }
  0x66   : > { %v275_v8 = vmul.f32 0.125, %v273_v7 }
  0x68   : > { %v276_v9 = vsub.f32 %v265_v0, %v275_v8 }
  0x6a   : > { %v277_v10 = vmul.f32 %v276_v9, %v276_v9 }
  0x6c   : > { %v278_v11 = vsel %vm266_vm0, %v277_v10, 0.0 }
  0x6d   : > { %v279_v12 = vrot.slane %v278_v11, 4 }
  0x6f   : > { %v280_v13 = vadd.f32 %v279_v12, %v278_v11 }
  0x71   : > { %v281_v14 = vrot.slane %v280_v13, 2 }
  0x73   : > { %v282_v15 = vadd.f32 %v281_v14, %v280_v13 }
  0x75   : > { %v283_v16 = vrot.slane %v282_v15, 1 }
  0x77   : > { %v284_v17 = vadd.f32 %v283_v16, %v282_v15 }
  0x79   : > { %v285_v18 = vmul.f32 0.125, %v284_v17 }
  0x7b   : > { %v286_v20 = vadd.f32 1e-05, %v285_v18 }
  0x7d   : > { %517 = vrsqrt.f32 %v286_v20 }
  0x87   : > { %v518_v26 = vpop.eup %517 }
  0x88   : > { %v288_v27 = vmul.f32 %v518_v26, %v276_v9 }
  0x8a   : > { %v297_v29 = vmul.f32 %v295_v25, %v288_v27 }
  0x8c   : > { %v305_v30 = vadd.f32 %v445_v28, %v297_v29 }
  0x8e   : > { %306 = vst.msk [vmem:[%s258_s30] sm:$0xff] %vm266_vm0, %v305_v30 }
  0x8f   : > { %592 = shalt.err (!%p589_p9)
}
  0x90   : > { %s593_s23 = scalar_lea.hbm %s873_s19, 128  ;;  %s597_s24 = scalar_lea.hbm %s924_s3, 256 }
  0x91   : > { %p594_p11 = scmp.ne.s32.totalorder %s873_s19, %s593_s23  ;;  %p598_p13 = scmp.lt.u32.totalorder %s873_s19, %s924_s3 }
  0x92   : > { %p599_p5 = scmp.lt.u32.totalorder %s597_s24, %s593_s23  ;;  %p601_p0 = scmp.lt.u32.totalorder %s593_s23, %s873_s19 }
  0x93   : > { %p595_p3 = pnand %p594_p11, %p937_p7 }
  0x94   : > { %p600_p8 = por %p599_p5, %p598_p13 }
  0x95   : > { %p596_p6 = pneg %p595_p3 }
  0x96   : > { %p602_p4 = por %p601_p0, %p600_p8 }
  0x98   : > { %p603_p10 = pnand %p602_p4, %p596_p6 }
  0x9a   : > { %606 = shalt.err (!%p603_p10)
}
  0x9b   : > { %454 = dma.vmem_to_hbm [thread:$0]  (%p937_p7), %s868_s5, 128, %s873_s19, %s308_s22  }
  0x9c PF: > { %s334_s9 = sand.u32 1, %s645_s12   ;;  %p938_p12 = scmp.ne.s32.totalorder %s930_s27, 0 }
  0x9d   : > { %p939_p1 = scmp.ge.s32.totalorder %s665_s17, 2  ;;  %s335_s30 = scalar_lea.sflag [#allocation4], %s334_s9 }
  0x9f   : > { %p464_p2 = pnand %p939_p1, %p938_p12 }
  0xa1   : > { %640 = dma.done.wait (!%p464_p2), %s335_s30, 128  }
  0xa2   : > { %642 = vsyncadd (!%p464_p2), %s335_s30, 4294967168  ;;  %s22_s17 = sadd.s32 1, %s665_s17   ;;  %s940_s12 = smov %s649_s13 }
  0xa3   : > { %p19_p9 = scmp.ge.s32.totalorder %s22_s17, 4   ;;  %s941_s13 = smov %s653_s14 }
  0xa4   : > { %s942_s14 = smov %s746_s26  ;;  %s943_s15 = smov %s661_s16 }
  0xa5   : > { %s944_s16 = smov %s946_s20  ;;  %21 = sbr.rel (!%p19_p9) target bundleno = 8 (0x8), region = 93 }
  0xac   :  { %340 = vsyncpa [#allocation3], 1 }
  0xad   :  { %342 = vsyncpa [#allocation3 + $0x1], 1 }
  0xae   :  { %343 = vsyncpa [#allocation6], 1 }
  0xaf   :  { %345 = vsyncpa [#allocation6 + $0x1], 1 }
  0xb0   :  { %346 = vsyncpa [#allocation4], 1 }
  0xb1   :  { %348 = vsyncpa [#allocation4 + $0x1], 1 }

</bundles_post_ra>
